<compile_context>
chip_gen: v7x
topology: tpu7x:2x2x1
jax: 0.10.0
libtpu: 0.0.40
codegen_flags: <defaults>
</compile_context>

<pallas_src>
import math

import jax
import jax.numpy as jnp
from jax.experimental import pallas as pl
from jax.experimental.pallas import tpu as pltpu

_LANE = 128       # vreg lane width -> lane-dense, unmasked stores
_MAX_ROWS = 2048  # max sublane rows per tile: 2048*128*4B = 1 MiB per buffer


def _round_up(x, m):
    return ((x + m - 1) // m) * m


def _scale_kernel(alpha_ref, x_ref, o_ref):
    # o = x * alpha; math in f32, stored back in the input dtype.
    a = alpha_ref[0, 0]
    o_ref[...] = (x_ref[...].astype(jnp.float32) * a).astype(o_ref.dtype)


@jax.jit
def _pallas_scale(x, alpha):
    """Elementwise x * alpha via a tiled Pallas TPU kernel (any shape/dtype)."""
    orig_shape, orig_dtype = x.shape, x.dtype
    flat = x.reshape(-1)
    n = flat.shape[0]

    rows = _round_up(max(pl.cdiv(n, _LANE), 1), 8)
    tr = rows if rows <= _MAX_ROWS else _MAX_ROWS
    rows = _round_up(rows, tr)

    padded = jnp.pad(flat, (0, rows * _LANE - n))
    x2d = padded.reshape(rows, _LANE)
    alpha_arr = jnp.full((1, 1), alpha, jnp.float32)

    out2d = pl.pallas_call(
        _scale_kernel,
        out_shape=jax.ShapeDtypeStruct((rows, _LANE), orig_dtype),
        grid=(rows // tr,),
        in_specs=[
            pl.BlockSpec(memory_space=pltpu.MemorySpace.SMEM),  # alpha scalar
            pl.BlockSpec((tr, _LANE), lambda i: (i, 0)),
        ],
        out_specs=pl.BlockSpec((tr, _LANE), lambda i: (i, 0)),
        compiler_params=pltpu.CompilerParams(
            dimension_semantics=("parallel",)),
    )(alpha_arr, x2d)

    return out2d.reshape(-1)[:n].reshape(orig_shape)


class GRL:
    """Gradient Reversal Layer: forward = input * 1.0, backward = -coeff * g."""

    def __init__(self, max_iter):
        self.iter_num = 0
        self.alpha = 10
        self.low = 0.0
        self.high = 1.0
        self.max_iter = max_iter

    def forward(self, x):
        # iter_num is Python-side module state (no tensor work), as in PyTorch.
        self.iter_num += 1
        return _pallas_scale(x, 1.0)

    def __call__(self, x):
        return self.forward(x)

    def backward(self, grad_output):
        # Mirrors the original plain-method backward (not autograd-registered).
        coeff = (2.0 * (self.high - self.low)
                 / (1.0 + math.exp(-self.alpha * self.iter_num / self.max_iter))
                 - (self.high - self.low) + self.low)
        return _pallas_scale(grad_output, -coeff)


if __name__ == "__main__":
    key = jax.random.PRNGKey(0)
    x = jax.random.normal(key, (2, 4, 16, 16), jnp.float32)

    grl = GRL(max_iter=4000)
    y = jax.block_until_ready(grl(x))

    assert y.shape == x.shape and y.dtype == x.dtype
    assert grl.iter_num == 1
    assert jnp.allclose(y, x), "GRL forward must be identity (input * 1.0)"

    # Exercise the backward hook once too (same kernel, different alpha).
    g = jax.block_until_ready(grl.backward(y))
    assert g.shape == x.shape

    print("KERNEL_OK")
</pallas_src>

<mosaic_0001>
module attributes {stable_mosaic.version = 11 : i64} {
  func.func @_scale_kernel(%arg0: i32, %arg1: memref<1x1xf32, #tpu.memory_space<smem>>, %arg2: memref<16x128xf32, #tpu.memory_space<vmem>>, %arg3: memref<16x128xf32, #tpu.memory_space<vmem>>) attributes {dimension_semantics = [#tpu.dimension_semantics<parallel>], iteration_bounds = array<i64: 1>, scalar_prefetch = 0 : i64, scratch_operands = 0 : i64, tpu.core_type = #tpu.core_type<tc>, window_params = [{transform_indices = @transform_0, window_bounds = array<i64: 1, 1>}, {transform_indices = @transform_1, window_bounds = array<i64: 16, 128>}, {transform_indices = @transform_2, window_bounds = array<i64: 16, 128>}]} {
    %c0 = arith.constant 0 : index
    %c0_0 = arith.constant 0 : index
    %0 = memref.load %arg1[%c0, %c0_0] : memref<1x1xf32, #tpu.memory_space<smem>>
    %c0_1 = arith.constant 0 : index
    %c0_2 = arith.constant 0 : index
    %1 = vector.load %arg2[%c0_1, %c0_2] : memref<16x128xf32, #tpu.memory_space<vmem>>, vector<16x128xf32>
    %2 = vector.broadcast %0 : f32 to vector<16x128xf32>
    %3 = arith.mulf %1, %2 : vector<16x128xf32>
    %c0_3 = arith.constant 0 : index
    %c0_4 = arith.constant 0 : index
    %4 = vector.load %arg3[%c0_3, %c0_4] : memref<16x128xf32, #tpu.memory_space<vmem>>, vector<16x128xf32>
    tpu.vector_store %arg3[%c0_3, %c0_4], %3 {strides = array<i32>} : memref<16x128xf32, #tpu.memory_space<vmem>>, vector<16x128xf32>,
    return
  }
  func.func @transform_0(%arg0: i32) -> (i32, i32) {
    %c0_i32 = arith.constant 0 : i32
    %c0_i32_0 = arith.constant 0 : i32
    %c0_i32_1 = arith.constant 0 : i32
    return %c0_i32, %c0_i32_0 : i32, i32
  }
  func.func @transform_1(%arg0: i32) -> (i32, i32) {
    %c0_i32 = arith.constant 0 : i32
    %c0_i32_0 = arith.constant 0 : i32
    return %arg0, %c0_i32 : i32, i32
  }
  func.func @transform_2(%arg0: i32) -> (i32, i32) {
    %c0_i32 = arith.constant 0 : i32
    %c0_i32_0 = arith.constant 0 : i32
    return %arg0, %c0_i32 : i32, i32
  }
}

</mosaic_0001>

<bundles_post_ra>
// kernel: _pallas_scale.1
= control target key start
LH: loop header
LB: loop body
LE: loop exit
PB: predicated region body
PF: predicated region fallthrough
CT: control target
= control target key end

     0   :  { %s54_s0 = inlined_call_operand.<no memory space> [shape: f32[1,1], index: 0, kind: input, shape index: {}]   ;;  %s55_s1 = inlined_call_operand.vmem [shape: f32[16,128], index: 1, kind: input, shape index: {}]   ;;  %s56_s2 = inlined_call_operand.vmem [shape: f32[16,128], index: 2, kind: output, shape index: {}]  }
   0x1   :  { %v13_v0 = vld [vmem:[%s55_s1] sm:$0xff]  ;;  %v15_v1 = vstv %s54_s0  ;;  %v14_v2 = vld [vmem:[%s55_s1 + $0x8] sm:$0xff] }
   0x2   :  { %v16_v3 = vmul.f32 %v15_v1, %v13_v0  ;;  %v17_v4 = vmul.f32 %v15_v1, %v14_v2 }
   0x4   :  { %18 = vst [vmem:[%s56_s2] sm:$0xff] %v16_v3  ;;  %19 = vst [vmem:[%s56_s2 + $0x8] sm:$0xff] %v17_v4 }

</bundles_post_ra>
